<compile_context>
chip_gen: v5e
topology: v5e:2x2
jax: 0.10.0
libtpu: 0.0.40
codegen_flags: <defaults>
</compile_context>

<pallas_src>
import functools

import jax
import jax.numpy as jnp
from jax.experimental import pallas as pl
from jax.experimental.pallas import tpu as pltpu


def _round_up(x, m):
    return (x + m - 1) // m * m


def _tpu_vmem_capacity_bytes():
    try:
        info = pltpu.get_tpu_info()
        for name in ("vmem_capacity_bytes", "vmem_size_bytes"):
            cap = getattr(info, name, None)
            if cap:
                return int(cap)
    except Exception:
        pass
    return 128 << 20  # v5e / v6e default


def _plan_tiles(P, B, K, Cn, Cc, Cout, out_itemsize, has_res_add, max_tile):
    """Pick the P tile (lane axis), padded extent and scoped-VMEM request."""
    cap = _tpu_vmem_capacity_bytes()
    # v7x has 64 MiB VMEM per TensorCore -> keep the scoped limit well below it.
    ceiling = (28 << 20) if cap <= (64 << 20) else (48 << 20)

    def need(tp):
        blocked = (K * Cn * tp * 2          # gathered neighbors, bf16
                   + Cc * tp * 2            # center (+fused residual) feats, bf16
                   + tp * 4                 # neighbor counts, int32
                   + Cout * tp * out_itemsize)  # output block
        if has_res_add:
            blocked += Cout * tp * 2        # identity-residual block, bf16
        weights = 2 * (Cout * Cn * 2 + Cout * Cc * 2 + Cout * 4)
        # compiler-managed temporaries: wide (Cout, K*tp) f32 matmul result,
        # f32 accumulator / cast copies.
        interm = Cout * K * tp * 4 + 3 * max(Cn, Cout) * tp * 4
        return 2 * blocked + weights + interm   # x2: double-buffered pipeline

    p128 = _round_up(max(P, 1), 128)
    tp = max(128, min(p128, (max_tile // 128) * 128 if max_tile >= 128 else 128))
    while tp > 128 and need(tp) > ceiling - (2 << 20):
        tp = max(128, ((tp // 2) // 128) * 128)
    # keep >= 2 grid steps when possible so both v7x TensorCores get work
    # (no-op on 1-TC v5e/v6e).
    if B == 1 and p128 > 128 and _round_up(P, tp) // tp < 2:
        tp = max(128, _round_up(p128 // 2, 128))
    p_pad = _round_up(P, tp)
    vmem_limit = int(min(ceiling, max(16 << 20, need(tp) + (4 << 20))))
    return tp, p_pad, vmem_limit


# ---------------------------------------------------------------------------
# Pallas kernel: EdgeConv 1x1 graph conv + aggregation over K neighbors, with
# the center / residual 1x1 convs, bias and ReLU fused.  Channel-first
# (lane-dense) layout; single wide MXU matmul over all K neighbors for 'max'.
# ---------------------------------------------------------------------------
def _graph_conv_kernel(nbr_ref, ctr_ref, cnt_ref, wnT_ref, wcT_ref, b_ref, *rest,
                       k_neighbors, tile_p, aggregate, apply_relu, has_res_add):
    if has_res_add:
        res_ref, o_ref = rest
    else:
        (o_ref,) = rest

    ctr = ctr_ref[0]                  # (Cc, tp)      bf16
    wnT = wnT_ref[...]                # (Cout, Cn)    bf16   (Wd^T)
    wcT = wcT_ref[...]                # (Cout, Cc)    bf16   ([Wc-Wd ; Wres]^T)
    b = b_ref[...]                    # (Cout, 1)     f32

    # center (+ fused residual) term: constant over K -> one matmul.
    out = jnp.dot(wcT, ctr, preferred_element_type=jnp.float32) + b     # (Cout, tp)

    nbr = nbr_ref[0]                  # (Cn, K*tp)    bf16, K chunks of tp points

    if aggregate == "max":
        # One wide MXU call over all K neighbors.  Invalid slots duplicate the
        # first valid neighbor (ball_query self-loop => cnt>=1), so no mask is
        # needed: duplicates cannot change a max.
        y = jnp.dot(wnT, nbr, preferred_element_type=jnp.float32)        # (Cout, K*tp)
        agg = y[:, 0:tile_p]
        for kk in range(1, k_neighbors):
            agg = jnp.maximum(agg, y[:, kk * tile_p:(kk + 1) * tile_p])
    else:  # mean: mask+sum in input space, then ONE matmul.
        cnt = cnt_ref[0]              # (1, tp)       int32
        acc = jnp.zeros((nbr.shape[0], tile_p), jnp.float32)
        for kk in range(k_neighbors):
            nk = nbr[:, kk * tile_p:(kk + 1) * tile_p].astype(jnp.float32)
            acc = acc + jnp.where(cnt > kk, nk, 0.0)
        inv = pl.reciprocal(jnp.maximum(cnt.astype(jnp.float32), 1.0), approx=True)
        agg = jnp.dot(wnT, (acc * inv).astype(jnp.bfloat16),
                      preferred_element_type=jnp.float32)                # (Cout, tp)

    out = out + agg

    if has_res_add:                   # identity residual (in_dim == out_dim)
        out = out + res_ref[0].astype(jnp.float32)

    if apply_relu:
        out = jnp.maximum(out, 0.0)

    o_ref[0] = out.astype(o_ref.dtype)


def _gather_tiled(nbr_src_bf, idx, tp, p_pad):
    """Gather neighbor features already in the kernel's tile order.

    nbr_src_bf (B, Cn, P) bf16, idx (B, P, K) int32 ->
    (B, Cn, n_tiles*K*tp) where each tile block is (Cn, K*tp) with K contiguous
    chunks of tp points.  Only the tiny index array is permuted; no full-tensor
    transpose of the gathered features.
    """
    B, Cn, P = nbr_src_bf.shape
    K = idx.shape[-1]
    nt = p_pad // tp
    idx_p = jnp.pad(idx, ((0, 0), (0, p_pad - P), (0, 0)))               # pad idx=0 (valid)
    idx_t = jnp.transpose(idx_p.reshape(B, nt, tp, K), (0, 1, 3, 2))     # (B, nt, K, tp)
    g = jax.vmap(lambda f, i: f[:, i])(nbr_src_bf, idx_t)                # (B, Cn, nt, K, tp)
    return g.reshape(B, Cn, nt * K * tp)


def graph_conv_aggregate(nbr_src_cf, nbr_idx, counts, center_cf,
                         w_nbr, w_center, bias, *, res_add_cf=None,
                         aggregate="max", apply_relu=True,
                         out_dtype=jnp.float32, max_tile=1024):
    """EdgeConv + aggregation + fused center/residual/ReLU (channel-first).

    nbr_src_cf (B, Cn, P) : features the neighbors are gathered from
    nbr_idx    (B, P, K)  : neighbor indices (invalid slots = first valid idx)
    counts     (B, P)     : number of valid neighbors per point (>= 1)
    center_cf  (B, Cc, P) : center-side features (may include fused residual chans)
    w_nbr      (Cn, Cout) : weight applied to gathered neighbors (Wd)
    w_center   (Cc, Cout) : weight applied to center features ([Wc-Wd ; Wres])
    bias       (Cout,)
    res_add_cf (B, Cout, P) optional identity residual added elementwise.
    Returns (B, Cout, P) in out_dtype, channel-first / lane-dense.
    """
    assert aggregate in ("max", "mean")
    B, Cn, P = nbr_src_cf.shape
    K = nbr_idx.shape[-1]
    Cc = center_cf.shape[1]
    Cout = w_nbr.shape[1]
    has_res_add = res_add_cf is not None
    out_itemsize = jnp.dtype(out_dtype).itemsize

    tp, p_pad, vmem_limit = _plan_tiles(P, B, K, Cn, Cc, Cout, out_itemsize,
                                        has_res_add, max_tile)
    nt = p_pad // tp
    pad = p_pad - P

    nbr = _gather_tiled(nbr_src_cf.astype(jnp.bfloat16), nbr_idx, tp, p_pad)
    ctr = jnp.pad(center_cf, ((0, 0), (0, 0), (0, pad))).astype(jnp.bfloat16)
    cnt = jnp.pad(counts, ((0, 0), (0, pad)))[:, None, :].astype(jnp.int32)
    wnT = jnp.transpose(w_nbr).astype(jnp.bfloat16)       # (Cout, Cn)
    wcT = jnp.transpose(w_center).astype(jnp.bfloat16)    # (Cout, Cc)
    b = bias.reshape(-1, 1).astype(jnp.float32)           # (Cout, 1)

    inputs = [nbr, ctr, cnt, wnT, wcT, b]
    in_specs = [
        pl.BlockSpec((1, Cn, K * tp), lambda bi, pi: (bi, 0, pi)),
        pl.BlockSpec((1, Cc, tp), lambda bi, pi: (bi, 0, pi)),
        pl.BlockSpec((1, 1, tp), lambda bi, pi: (bi, 0, pi)),
        pl.BlockSpec((Cout, Cn), lambda bi, pi: (0, 0)),
        pl.BlockSpec((Cout, Cc), lambda bi, pi: (0, 0)),
        pl.BlockSpec((Cout, 1), lambda bi, pi: (0, 0)),
    ]
    if has_res_add:
        res = jnp.pad(res_add_cf, ((0, 0), (0, 0), (0, pad))).astype(jnp.bfloat16)
        inputs.append(res)
        in_specs.append(pl.BlockSpec((1, Cout, tp), lambda bi, pi: (bi, 0, pi)))

    kernel = functools.partial(_graph_conv_kernel, k_neighbors=K, tile_p=tp,
                               aggregate=aggregate, apply_relu=apply_relu,
                               has_res_add=has_res_add)

    mm_k = K * Cn if aggregate == "max" else Cn
    flops = 2 * B * p_pad * Cout * (mm_k + Cc) + (2 * B * p_pad * Cout if has_res_add else 0)
    bytes_accessed = (sum(int(a.size) * a.dtype.itemsize for a in inputs)
                      + B * Cout * p_pad * out_itemsize)

    out = pl.pallas_call(
        kernel,
        out_shape=jax.ShapeDtypeStruct((B, Cout, p_pad), out_dtype),
        grid=(B, nt),
        in_specs=in_specs,
        out_specs=pl.BlockSpec((1, Cout, tp), lambda bi, pi: (bi, 0, pi)),
        compiler_params=pltpu.CompilerParams(
            dimension_semantics=("parallel", "parallel"),
            vmem_limit_bytes=vmem_limit),
        cost_estimate=pl.CostEstimate(
            flops=flops,
            transcendentals=(B * p_pad if aggregate == "mean" else 0),
            bytes_accessed=bytes_accessed),
    )(*inputs)
    return out[:, :, :P]


# ---------------------------------------------------------------------------
# JAX glue: radius-graph neighbor search, 3-NN linear upsampling.
# (data-dependent gathers; kept outside the kernels)
# ---------------------------------------------------------------------------
def ball_query(xyz, centers, radius, k):
    """xyz (B,P,3), centers (B,Q,3) -> nbr_idx (B,Q,k) int32, counts (B,Q) int32.
    Self-loops are always included (distance 0 <= radius), so counts >= 1 and
    invalid slots are padded with the first valid index."""
    # TODO(synk): O(P^2) distance matrix; chunk/tile for production point counts.
    d2 = jnp.sum((centers[:, :, None, :] - xyz[:, None, :, :]) ** 2, axis=-1)  # (B,Q,P)
    P = xyz.shape[1]
    within = d2 <= radius * radius
    idx_all = jnp.arange(P, dtype=jnp.int32)
    key = jnp.where(within, idx_all[None, None, :], P)        # invalid -> P (sorts last)
    nbr_idx = jnp.sort(key, axis=-1)[:, :, :k]
    counts = jnp.minimum(jnp.sum(within, axis=-1), k).astype(jnp.int32)
    first = nbr_idx[:, :, :1]                                  # pad with first valid idx
    nbr_idx = jnp.where(nbr_idx < P, nbr_idx, first)
    nbr_idx = jnp.minimum(nbr_idx, P - 1).astype(jnp.int32)    # explicit OOB guard
    return nbr_idx, counts


def upsample_linear_cf(src_xyz, dst_xyz, feats_cf, eps=1e-8):
    """3-NN inverse-distance interpolation, channel-first (B,C,Ps) -> (B,C,Pd)."""
    d2 = jnp.sum((dst_xyz[:, :, None, :] - src_xyz[:, None, :, :]) ** 2, axis=-1)
    neg_d2, idx = jax.lax.top_k(-d2, 3)                        # (B,Pd,3)
    w = 1.0 / (-neg_d2 + eps)
    w = w / jnp.sum(w, axis=-1, keepdims=True)
    g = jax.vmap(lambda f, i: f[:, i])(feats_cf, idx)          # (B, C, Pd, 3)
    return jnp.sum(g * w[:, None, :, :].astype(jnp.float32), axis=-1)


# ---------------------------------------------------------------------------
# GraphConvUpBlock forward
# ---------------------------------------------------------------------------
def init_params(key, in_dim, out_dim):
    """conv1: Conv2d(2*in, out, 1); conv2: Conv2d(2*out, out, 1);
    res: Conv1d(in, out, 1, bias=False) (None => Identity when in==out).
    Each 1x1 conv weight is stored as two transposed halves (C, out):
    'd' multiplies (nbr - ctr), 'c' multiplies ctr."""
    ks = jax.random.split(key, 7)
    s1 = (2.0 / (2 * in_dim)) ** 0.5
    s2 = (2.0 / (2 * out_dim)) ** 0.5
    sr = (2.0 / in_dim) ** 0.5
    return {
        "wd1": s1 * jax.random.normal(ks[0], (in_dim, out_dim), jnp.float32),
        "wc1": s1 * jax.random.normal(ks[1], (in_dim, out_dim), jnp.float32),
        "b1": 0.01 * jax.random.normal(ks[2], (out_dim,), jnp.float32),
        "wd2": s2 * jax.random.normal(ks[3], (out_dim, out_dim), jnp.float32),
        "wc2": s2 * jax.random.normal(ks[4], (out_dim, out_dim), jnp.float32),
        "b2": 0.01 * jax.random.normal(ks[5], (out_dim,), jnp.float32),
        "w_res": (sr * jax.random.normal(ks[6], (in_dim, out_dim), jnp.float32)
                  if in_dim != out_dim else None),             # None => Identity
    }


def graph_conv_up_block(xyz, parent_xyz, feats, params, *, k=(8, 8),
                        radius=(0.5, 0.4), aggregate="max", max_tile=1024):
    """xyz (B,P1,3) low-res coords, parent_xyz (B,P0,3) high-res coords,
    feats (B,in_dim,P1) channel-first (PyTorch Conv1d convention).
    Returns (B,out_dim,P0) channel-first float32."""
    feats_bf = feats.astype(jnp.bfloat16)

    # graph conv 1 on the low-res graph (RadiusGraph(k[0], radius[0], 1)) + ReLU,
    # emitted in bf16 (it is consumed in bf16 downstream anyway).
    idx1, cnt1 = ball_query(xyz, xyz, radius[0], k[0])
    x = graph_conv_aggregate(feats_bf, idx1, cnt1, feats_bf,
                             params["wd1"], params["wc1"] - params["wd1"],
                             params["b1"], aggregate=aggregate, apply_relu=True,
                             out_dtype=jnp.bfloat16, max_tile=max_tile)   # (B, Cout, P1)

    # point upsampling ('linear': 3-NN inverse-distance interpolation)
    x_up = upsample_linear_cf(xyz, parent_xyz, x).astype(jnp.bfloat16)          # (B, Cout, P0)
    feats_up = upsample_linear_cf(xyz, parent_xyz, feats_bf).astype(jnp.bfloat16)  # (B, Cin, P0)

    # graph conv 2 on the high-res graph (RadiusGraph(k[1], radius[1], 1)), with
    # the residual 1x1 conv and the final ReLU fused into the same kernel.
    idx2, cnt2 = ball_query(parent_xyz, parent_xyz, radius[1], k[1])
    wcd2 = params["wc2"] - params["wd2"]
    if params["w_res"] is not None:
        # fuse center + residual into one matmul: [x_up ; feats_up] x [Wc-Wd ; Wres]
        ctr2 = jnp.concatenate([x_up, feats_up], axis=1)
        w_ctr2 = jnp.concatenate([wcd2, params["w_res"]], axis=0)
        out = graph_conv_aggregate(x_up, idx2, cnt2, ctr2,
                                   params["wd2"], w_ctr2, params["b2"],
                                   aggregate=aggregate, apply_relu=True,
                                   out_dtype=jnp.float32, max_tile=max_tile)
    else:
        # identity residual: skip the matmul, add elementwise in the epilogue.
        out = graph_conv_aggregate(x_up, idx2, cnt2, x_up,
                                   params["wd2"], wcd2, params["b2"],
                                   res_add_cf=feats_up,
                                   aggregate=aggregate, apply_relu=True,
                                   out_dtype=jnp.float32, max_tile=max_tile)
    return out                                                  # (B, Cout, P0)


if __name__ == "__main__":
    B, P1, P0 = 2, 128, 256
    in_dim, out_dim = 16, 32

    key = jax.random.PRNGKey(0)
    kx, kp, kf, kw = jax.random.split(key, 4)
    xyz = jax.random.uniform(kx, (B, P1, 3), jnp.float32)
    parent_xyz = jax.random.uniform(kp, (B, P0, 3), jnp.float32)
    feats = jax.random.normal(kf, (B, in_dim, P1), jnp.float32)
    params = init_params(kw, in_dim, out_dim)

    out = graph_conv_up_block(xyz, parent_xyz, feats, params,
                              k=(8, 8), radius=(0.7, 0.5), aggregate="max")
    out = jax.block_until_ready(out)
    assert out.shape == (B, out_dim, P0), out.shape
    assert bool(jnp.all(jnp.isfinite(out)))
    print("KERNEL_OK")
</pallas_src>

<mosaic_0001>
module attributes {stable_mosaic.version = 11 : i64} {
  func.func @_graph_conv_kernel(%arg0: i32, %arg1: i32, %arg2: memref<1x16x1024xbf16, #tpu.memory_space<vmem>>, %arg3: memref<1x16x128xbf16, #tpu.memory_space<vmem>>, %arg4: memref<1x1x128xi32, #tpu.memory_space<vmem>>, %arg5: memref<32x16xbf16, #tpu.memory_space<vmem>>, %arg6: memref<32x16xbf16, #tpu.memory_space<vmem>>, %arg7: memref<32x1xf32, #tpu.memory_space<vmem>>, %arg8: memref<1x32x128xbf16, #tpu.memory_space<vmem>>) attributes {dimension_semantics = [#tpu.dimension_semantics<parallel>, #tpu.dimension_semantics<parallel>], iteration_bounds = array<i64: 2, 1>, scalar_prefetch = 0 : i64, scratch_operands = 0 : i64, tpu.core_type = #tpu.core_type<tc>, window_params = [{transform_indices = @transform_0, window_bounds = array<i64: 1, 16, 1024>}, {transform_indices = @transform_1, window_bounds = array<i64: 1, 16, 128>}, {transform_indices = @transform_2, window_bounds = array<i64: 1, 1, 128>}, {pipeline_mode = #tpu.pipeline_mode<synchronous>, transform_indices = @transform_3, window_bounds = array<i64: 32, 16>}, {pipeline_mode = #tpu.pipeline_mode<synchronous>, transform_indices = @transform_4, window_bounds = array<i64: 32, 16>}, {pipeline_mode = #tpu.pipeline_mode<synchronous>, transform_indices = @transform_5, window_bounds = array<i64: 32, 1>}, {transform_indices = @transform_6, window_bounds = array<i64: 1, 32, 128>}]} {
    %c0 = arith.constant 0 : index
    %c0_0 = arith.constant 0 : index
    %c0_1 = arith.constant 0 : index
    %0 = vector.load %arg3[%c0, %c0_0, %c0_1] : memref<1x16x128xbf16, #tpu.memory_space<vmem>>, vector<1x16x128xbf16>
    %1 = vector.shape_cast %0 : vector<1x16x128xbf16> to vector<16x128xbf16>
    %c0_2 = arith.constant 0 : index
    %c0_3 = arith.constant 0 : index
    %2 = vector.load %arg5[%c0_2, %c0_3] : memref<32x16xbf16, #tpu.memory_space<vmem>>, vector<32x16xbf16>
    %c0_4 = arith.constant 0 : index
    %c0_5 = arith.constant 0 : index
    %3 = vector.load %arg6[%c0_4, %c0_5] : memref<32x16xbf16, #tpu.memory_space<vmem>>, vector<32x16xbf16>
    %c0_6 = arith.constant 0 : index
    %c0_7 = arith.constant 0 : index
    %4 = vector.load %arg7[%c0_6, %c0_7] : memref<32x1xf32, #tpu.memory_space<vmem>>, vector<32x1xf32>
    %cst = arith.constant dense<0.000000e+00> : vector<32x128xf32>
    %5 = tpu.matmul %3, %1, %cst {dimension_numbers = #tpu.dot_dimension_numbers<[1], [0], [0], [1], [0, 0, 1, 1], [], []>} : vector<32x16xbf16>, vector<16x128xbf16>, vector<32x128xf32> -> vector<32x128xf32>
    %6 = vector.broadcast %4 : vector<32x1xf32> to vector<32x128xf32>
    %7 = arith.addf %5, %6 : vector<32x128xf32>
    %c0_8 = arith.constant 0 : index
    %c0_9 = arith.constant 0 : index
    %c0_10 = arith.constant 0 : index
    %8 = vector.load %arg2[%c0_8, %c0_9, %c0_10] : memref<1x16x1024xbf16, #tpu.memory_space<vmem>>, vector<1x16x1024xbf16>
    %9 = vector.shape_cast %8 : vector<1x16x1024xbf16> to vector<16x1024xbf16>
    %cst_11 = arith.constant dense<0.000000e+00> : vector<32x1024xf32>
    %10 = tpu.matmul %2, %9, %cst_11 {dimension_numbers = #tpu.dot_dimension_numbers<[1], [0], [0], [1], [0, 0, 1, 1], [], []>} : vector<32x16xbf16>, vector<16x1024xbf16>, vector<32x1024xf32> -> vector<32x1024xf32>
    %11 = vector.extract_strided_slice %10 {offsets = [0, 0], sizes = [32, 128], strides = [1, 1]} : vector<32x1024xf32> to vector<32x128xf32>
    %12 = vector.extract_strided_slice %10 {offsets = [0, 128], sizes = [32, 128], strides = [1, 1]} : vector<32x1024xf32> to vector<32x128xf32>
    %13 = arith.maximumf %11, %12 : vector<32x128xf32>
    %14 = vector.extract_strided_slice %10 {offsets = [0, 256], sizes = [32, 128], strides = [1, 1]} : vector<32x1024xf32> to vector<32x128xf32>
    %15 = arith.maximumf %13, %14 : vector<32x128xf32>
    %16 = vector.extract_strided_slice %10 {offsets = [0, 384], sizes = [32, 128], strides = [1, 1]} : vector<32x1024xf32> to vector<32x128xf32>
    %17 = arith.maximumf %15, %16 : vector<32x128xf32>
    %18 = vector.extract_strided_slice %10 {offsets = [0, 512], sizes = [32, 128], strides = [1, 1]} : vector<32x1024xf32> to vector<32x128xf32>
    %19 = arith.maximumf %17, %18 : vector<32x128xf32>
    %20 = vector.extract_strided_slice %10 {offsets = [0, 640], sizes = [32, 128], strides = [1, 1]} : vector<32x1024xf32> to vector<32x128xf32>
    %21 = arith.maximumf %19, %20 : vector<32x128xf32>
    %22 = vector.extract_strided_slice %10 {offsets = [0, 768], sizes = [32, 128], strides = [1, 1]} : vector<32x1024xf32> to vector<32x128xf32>
    %23 = arith.maximumf %21, %22 : vector<32x128xf32>
    %24 = vector.extract_strided_slice %10 {offsets = [0, 896], sizes = [32, 128], strides = [1, 1]} : vector<32x1024xf32> to vector<32x128xf32>
    %25 = arith.maximumf %23, %24 : vector<32x128xf32>
    %26 = arith.addf %7, %25 : vector<32x128xf32>
    %cst_12 = arith.constant 0.000000e+00 : f32
    %27 = vector.broadcast %cst_12 : f32 to vector<32x128xf32>
    %28 = arith.maximumf %26, %27 : vector<32x128xf32>
    %29 = arith.truncf %28 : vector<32x128xf32> to vector<32x128xbf16>
    %c0_13 = arith.constant 0 : index
    %c0_14 = arith.constant 0 : index
    %c0_15 = arith.constant 0 : index
    %30 = vector.load %arg8[%c0_13, %c0_14, %c0_15] : memref<1x32x128xbf16, #tpu.memory_space<vmem>>, vector<1x32x128xbf16>
    %31 = vector.shape_cast %30 : vector<1x32x128xbf16> to vector<32x128xbf16>
    %32 = vector.shape_cast %29 : vector<32x128xbf16> to vector<1x32x128xbf16>
    tpu.vector_store %arg8[%c0_13, %c0_14, %c0_15], %32 {strides = array<i32>} : memref<1x32x128xbf16, #tpu.memory_space<vmem>>, vector<1x32x128xbf16>,
    return
  }
  func.func @transform_0(%arg0: i32, %arg1: i32) -> (i32, i32, i32) {
    %c0_i32 = arith.constant 0 : i32
    %c0_i32_0 = arith.constant 0 : i32
    return %arg0, %c0_i32, %arg1 : i32, i32, i32
  }
  func.func @transform_1(%arg0: i32, %arg1: i32) -> (i32, i32, i32) {
    %c0_i32 = arith.constant 0 : i32
    %c0_i32_0 = arith.constant 0 : i32
    return %arg0, %c0_i32, %arg1 : i32, i32, i32
  }
  func.func @transform_2(%arg0: i32, %arg1: i32) -> (i32, i32, i32) {
    %c0_i32 = arith.constant 0 : i32
    %c0_i32_0 = arith.constant 0 : i32
    return %arg0, %c0_i32, %arg1 : i32, i32, i32
  }
  func.func @transform_3(%arg0: i32, %arg1: i32) -> (i32, i32) {
    %c0_i32 = arith.constant 0 : i32
    %c0_i32_0 = arith.constant 0 : i32
    %c0_i32_1 = arith.constant 0 : i32
    return %c0_i32, %c0_i32_0 : i32, i32
  }
  func.func @transform_4(%arg0: i32, %arg1: i32) -> (i32, i32) {
    %c0_i32 = arith.constant 0 : i32
    %c0_i32_0 = arith.constant 0 : i32
    %c0_i32_1 = arith.constant 0 : i32
    return %c0_i32, %c0_i32_0 : i32, i32
  }
  func.func @transform_5(%arg0: i32, %arg1: i32) -> (i32, i32) {
    %c0_i32 = arith.constant 0 : i32
    %c0_i32_0 = arith.constant 0 : i32
    %c0_i32_1 = arith.constant 0 : i32
    return %c0_i32, %c0_i32_0 : i32, i32
  }
  func.func @transform_6(%arg0: i32, %arg1: i32) -> (i32, i32, i32) {
    %c0_i32 = arith.constant 0 : i32
    %c0_i32_0 = arith.constant 0 : i32
    return %arg0, %c0_i32, %arg1 : i32, i32, i32
  }
}

</mosaic_0001>

<bundles_post_ra>
// kernel: tpu_custom_call.1
= control target key start
LH: loop header
LB: loop body
LE: loop exit
PB: predicated region body
PF: predicated region fallthrough
CT: control target
= control target key end

     0   :  { %11 = vsyncpa [#allocation3], 0  ;;  %s1347_s0 = inlined_call_operand.hbm [shape: bf16[2,16,1024], index: 0, kind: input, shape index: {}]   ;;  %s1348_s1 = inlined_call_operand.vmem [shape: bf16[2,16,128], index: 1, kind: input, shape index: {}]   ;;  %s1349_s2 = inlined_call_operand.vmem [shape: s32[2,1,128], index: 2, kind: input, shape index: {}]   ;;  %s1350_s3 = inlined_call_operand.vmem [shape: bf16[32,16], index: 3, kind: input, shape index: {}]   ;;  %s1351_s4 = inlined_call_operand.vmem [shape: bf16[32,16], index: 4, kind: input, shape index: {}]   ;;  %s1352_s5 = inlined_call_operand.vmem [shape: f32[32,1], index: 5, kind: input, shape index: {}]   ;;  %s1353_s6 = inlined_call_operand.hbm [shape: bf16[2,32,128], index: 6, kind: output, shape index: {}]  }
   0x1   :  { %13 = vsyncpa [#allocation3 + $0x1], 0 }
   0x2   :  { %14 = vsyncpa [#allocation4], 0 }
   0x3   :  { %16 = vsyncpa [#allocation4 + $0x1], 0  ;;  %s1155_s21 = smov 0   ;;  %s1157_s22 = smov 0  }
   0x4   :  { %s1159_s2 = smov 0   ;;  %s1161_s23 = smov 0  }
   0x5   :  { %s1163_s24 = smov 0   ;;  %s1165_s25 = smov 0  }
   0x6 LB: > { %s817_s26 = sadd.s32 4294967295, %s1113_s25   ;;  %s818_s27 = sadd.s32 4294967294, %s1113_s25   ;;  %s1113_s25 = sphi %s1165_s25, %s22_s25   ;;  %s1109_s24 = sphi %s1163_s24, %s1362_s24   ;;  %s1105_s23 = sphi %s1161_s23, %s1361_s23   ;;  %s1101_s2 = sphi %s1159_s2, %s1360_s2   ;;  %s1097_s22 = sphi %s1157_s22, %s1359_s22   ;;  %s1093_s21 = sphi %s1155_s21, %s1358_s21  }
   0x7   : > { %s34_s28 = sadd.s32 1, %s1109_s24  ;;  %s43_s29 = sadd.s32 1, %s1101_s2 }
   0x8   : > { %p36_p0 = scmp.ge.s32.totalorder %s34_s28, 2  ;;  %p50_p1 = scmp.ne.s32.totalorder %s1101_s2, %s1097_s22 }
   0x9   : > { %p51_p2 = scmp.eq.s32.totalorder %s1113_s25, 0  ;;  %p56_p3 = scmp.ne.s32.totalorder %s1097_s22, %s1093_s21 }
   0xa   : > { %s1364_s28 = smov (%p36_p0, %s34_s28), 0  ;;  %p57_p5 = scmp.eq.s32.totalorder %s817_s26, 0 }
   0xb   : > { %p1196_p4 = por %p51_p2, %p50_p1  ;;  %s38_s7 = ssub.s32 %s1109_s24, %s1364_s28 }
   0xc   : > { %p201_p6 = scmp.eq.s32.totalorder %s817_s26, 1  ;;  %p41_p7 = scmp.eq.s32.totalorder %s38_s7, 0 }
   0xd   : > { %p1202_p8 = por %p57_p5, %p56_p3  ;;  %p207_p10 = scmp.eq.s32.totalorder %s818_s27, 1 }
   0xe   : > { %p1206_p9 = por %p201_p6, %p50_p1  ;;  %p820_p12 = scmp.ge.s32.totalorder %s1113_s25, 2 }
   0xf   : > { %s1211_s10 = scalar_select %p41_p7, %s1101_s2, %s43_s29  }
  0x10   : > { %p1213_p11 = por %p207_p10, %p56_p3  ;;  %p944_p13 = scmp.lt.s32.totalorder %s1113_s25, 2 }
  0x11   : > { %s236_s12 = sand.u32 1, %s1101_s2   ;;  %s904_s14 = sshll.u32 %s1109_s24, 6 }
  0x12   : > { %s821_s13 = sshll.u32 %s236_s12, 6  ;;  %s247_s17 = scalar_lea.hbm %s1347_s0, %s904_s14 }
  0x13   : > { %s240_s18 = scalar_lea.vmem [#allocation2], %s821_s13  ;;  %s248_s20 = sshll.u32 %s247_s17, 4  ;;  %s249_s20 = int_to_ptr.hbm [resolvable:$true] %s248_s20 }
  0x14   : > { %s250_s19 = sshll.u32 %s240_s18, 4  ;;  %p937_p0 = pnand %p944_p13, %p1196_p4  ;;  %s251_s19 = int_to_ptr.vmem [resolvable:$true] %s250_s19 }
  0x15   : > { %p824_p1 = scmp.ge.s32.totalorder %s1113_s25, 1  ;;  %s237_s26 = scalar_lea.sflag [#allocation3], %s236_s12 }
  0x16   : > { %s1115_s27 = smov 512   ;;  %s1116_s29 = smov 32  }
  0x17   : > { %939 = dma.hbm_to_vmem [thread:$0]  (!%p937_p0), %s249_s20, 1024, %s251_s19, %s237_s26, %s1115_s27, %s1115_s27, %s1116_s29  }
  0x18   : > { %p278_p2 = scmp.lt.s32.totalorder %s1113_s25, 3 }
  0x1a   : > { %p279_p3 = pnand %p824_p1, %p278_p2 }
  0x1b   : > { %s1229_s7 = sand.u32 (!%p279_p3), 1, %s1097_s22  }
  0x1c   : > { %282 = sbr.rel (%p279_p3) target bundleno = 260 (0x104), region = 44  ;;  %s825_s13 = sshll.u32 (!%p279_p3), %s1229_s7, 6 }
  0x1d   : > { %s285_s14 = scalar_lea.sflag (!%p279_p3), [#allocation3], %s1229_s7  ;;  %s1233_s15 = scalar_lea.vmem (!%p279_p3), [#allocation2], %s825_s13 }
  0x21   : > { %1084 = dma.done.wait (%p1202_p8), %s285_s14, 1024  }
  0x22   : > { %1086 = vsyncadd (%p1202_p8), %s285_s14, 4294966272  ;;  %p333_p4 = scmp.lt.s32.totalorder %s1105_s23, 1  ;;  %v1117_v0 = vmov 0   ;;  %v909_v2 = vld [vmem:[%s1351_s4] sm:$0xff]  ;;  %vm398_vm0 = vcmask 130048   ;;  %v910_v3 = vld [vmem:[%s1351_s4 + $0x8] sm:$0xff] }
  0x23   : > { %1000 = vset.pattern.permute.xlu1 %v1117_v0  ;;  %999 = vset.pattern.permute.xlu0 %v1117_v0  ;;  %v853_v4 = vld [vmem:[%s1233_s15] sm:$0xf]  ;;  %v911_v6 = vld [vmem:[%s1233_s15 + $0x4] sm:$0xf]  ;;  %v861_v9 = vld [vmem:[%s1233_s15 + $0x8] sm:$0xf] }
  0x24   : > { %s334_s30 = scalar_select %p333_p4, %s1105_s23, 1  ;;  %v915_v5 = vld [vmem:[%s1233_s15 + $0x1c] sm:$0xf0]  ;;  %v855_v8 = vld [vmem:[%s1233_s15 + $0x20] sm:$0xf0]  ;;  %v360_v17 = vld [vmem:[%s1352_s5 + $0x10] sm:$0xff] }
  0x25   : > { %v854_v7 = vor.u32 %v915_v5, %v853_v4  ;;  %v916_v10 = vld [vmem:[%s1233_s15 + $0x24] sm:$0xf0]  ;;  %v858_v11 = vor.u32 %v911_v6, %v855_v8  ;;  %v907_v13 = vld [vmem:[%s1350_s3] sm:$0xff]  ;;  %v912_v14 = vld [vmem:[%s1233_s15 + $0xc] sm:$0xf]  ;;  %374 = vperm.xlu1 %1000, %v360_v17   ;;  %s826_s20 = sshll.u32 %s1229_s7, 4 }
  0x26   : > { %s905_s12 = sshll.u32 %s334_s30, 3  ;;  %v862_v12 = vor.u32 %v916_v10, %v861_v9  ;;  %v863_v15 = vld [vmem:[%s1233_s15 + $0x28] sm:$0xf0]  ;;  %v358_v18 = vld [vmem:[%s1352_s5] sm:$0xff]  ;;  %v913_v19 = vld [vmem:[%s1233_s15 + $0x14] sm:$0xf] }
  0x27   : > { %s340_s18 = scalar_lea.vmem %s1348_s1, %s905_s12  ;;  %v866_v16 = vor.u32 %v912_v14, %v863_v15  ;;  %v871_v20 = vld [vmem:[%s1233_s15 + $0x30] sm:$0xf0]  ;;  %v877_v21 = vld [vmem:[%s1233_s15 + $0x18] sm:$0xf]  ;;  %514 = vmatpush.bf16.msra.mxu2 %v858_v11  ;;  %v869_v25 = vld [vmem:[%s1233_s15 + $0x10] sm:$0xf]  ;;  %364 = vperm.xlu0 %999, %v358_v18  }
  0x28   : > { %v906_v1 = vld [vmem:[%s340_s18] sm:$0xff]  ;;  %v918_v22 = vld [vmem:[%s1233_s15 + $0x34] sm:$0xf0]  ;;  %533 = vmatpush.bf16.msra.mxu3 %v862_v12  ;;  %v874_v23 = vor.u32 %v913_v19, %v871_v20  ;;  %v917_v26 = vld [vmem:[%s1233_s15 + $0x2c] sm:$0xf0]  ;;  %s331_s26 = scalar_lea.vmem [#allocation5], %s826_s20 }
  0x29   : > { %412 = vmatpush.bf16.msra.mxu0 %v906_v1  ;;  %931 = vmatpush.bf16.msra.mxu1 %v906_v1  ;;  %v878_v24 = vor.u32 %v918_v22, %v877_v21  ;;  %v870_v27 = vor.u32 %v917_v26, %v869_v25  ;;  %v914_v28 = vld [vmem:[%s1233_s15 + $0x1c] sm:$0xf]  ;;  %v359_v32 = vld [vmem:[%s1352_s5 + $0x8] sm:$0xff]  ;;  %s919_s27 = sshll.u32 %s1105_s23, 4  ;;  %s698_s30 = sshll.u32 %s331_s26, 4  ;;  %s699_s30 = int_to_ptr.vmem [resolvable:$true] %s698_s30 }
  0x2a   : > { %v879_v29 = vld [vmem:[%s1233_s15 + $0x38] sm:$0xf0]  ;;  %885 = vmatmul.msk.bf16.vlgmr.msra.gmra.mxu2 %vm398_vm0, %v907_v13  ;;  %v908_v33 = vld [vmem:[%s1350_s3 + $0x8] sm:$0xff]  ;;  %s697_s14 = scalar_lea.hbm %s1353_s6, %s919_s27  ;;  %s685_s23 = scalar_lea.sflag [#allocation4], %s1229_s7 }
  0x2b   : > { %590 = vmatpush.bf16.msrb.mxu2 %v874_v23  ;;  %887 = vmatmul.msk.bf16.vlgmr.msra.gmra.mxu3 %vm398_vm0, %v907_v13  ;;  %v882_v30 = vor.u32 %v914_v28, %v879_v29  ;;  %v361_v31 = vld [vmem:[%s1352_s5 + $0x18] sm:$0xff]  ;;  %s700_s12 = sshll.u32 %s697_s14, 4  ;;  %s1051_s15 = scalar_lea.hbm %s1353_s6, 32  ;;  %s701_s12 = int_to_ptr.hbm [resolvable:$true] %s700_s12 }
  0x2c   : > { %841 = vmatmul.msk.bf16.vlgmr.msra.gmra.mxu0 %vm398_vm0, %v909_v2  ;;  %842 = vmatmul.msk.bf16.vlgmr.msra.gmra.mxu1 %vm398_vm0, %v910_v3  ;;  %s1045_s16 = sshra.s32 %s701_s12, 4  ;;  %s1046_s16 = int_to_ptr.hbm [resolvable:$true] %s1045_s16 }
  0x2d   : > { %495 = vmatpush.bf16.msrb.mxu1 %v854_v7  ;;  %552 = vmatpush.bf16.msrb.mxu0 %v866_v16  ;;  %s1047_s17 = scalar_lea.hbm %s1046_s16, 16  ;;  %p1052_p8 = scmp.lt.s32.totalorder %s1046_s16, %s1353_s6 }
  0x2e   : > { %609 = vmatpush.bf16.msrb.mxu3 %v878_v24  ;;  %379 = vperm.xlu1 %1000, %v361_v31   ;;  %p1048_p5 = scmp.ne.s32.totalorder %s1046_s16, %s1047_s17  ;;  %p1053_p10 = scmp.lt.s32.totalorder %s1051_s15, %s1047_s17 }
  0x2f   : > { %369 = vperm.xlu0 %999, %v359_v32  }
  0x30   : > { %p1049_p6 = pnand %p1048_p5, %p1206_p9  ;;  %p1054_p13 = por %p1053_p10, %p1052_p8 }
  0x31   : > { %571 = vmatpush.bf16.msra.mxu1 %v870_v27  ;;  %628 = vmatpush.bf16.msra.mxu0 %v882_v30 }
  0x32   : > { %p1050_p7 = pneg %p1049_p6 }
  0x34   : > { %p1055_p0 = pnand %p1054_p13, %p1050_p7 }
  0x3a   : > { %886 = vmatmul.msk.bf16.gmra.mxu2 %vm398_vm0, %v908_v33 }
  0x3b   : > { %888 = vmatmul.msk.bf16.gmra.mxu3 %vm398_vm0, %v908_v33 }
  0x3c   : > { %883 = vmatmul.msk.bf16.vlgmr.msrb.gmra.mxu1 %vm398_vm0, %v907_v13  ;;  %889 = vmatmul.msk.bf16.vlgmr.msrb.gmra.mxu0 %vm398_vm0, %v907_v13 }
  0x4a   : > { %893 = vmatmul.msk.bf16.vlgmr.msrb.gmra.mxu2 %vm398_vm0, %v907_v13 }
  0x4b   : > { %895 = vmatmul.msk.bf16.vlgmr.msrb.gmra.mxu3 %vm398_vm0, %v907_v13 }
  0x4c   : > { %884 = vmatmul.msk.bf16.gmra.mxu1 %vm398_vm0, %v908_v33  ;;  %890 = vmatmul.msk.bf16.gmra.mxu0 %vm398_vm0, %v908_v33 }
  0x5a   : > { %894 = vmatmul.msk.bf16.gmra.mxu2 %vm398_vm0, %v908_v33 }
  0x5b   : > { %896 = vmatmul.msk.bf16.gmra.mxu3 %vm398_vm0, %v908_v33 }
  0x5c   : > { %891 = vmatmul.msk.bf16.vlgmr.msra.gmra.mxu1 %vm398_vm0, %v907_v13  ;;  %897 = vmatmul.msk.bf16.vlgmr.msra.gmra.mxu0 %vm398_vm0, %v907_v13 }
  0x6c   : > { %892 = vmatmul.msk.bf16.gmra.mxu1 %vm398_vm0, %v908_v33  ;;  %898 = vmatmul.msk.bf16.gmra.mxu0 %vm398_vm0, %v908_v33 }
  0x97   : > { %v375_v25 = vpop.permute.xlu1 %374 }
  0x99   : > { %v365_v62 = vpop.permute.xlu0 %364 }
  0xa1   : > { %v370_v10 = vpop.permute.xlu0 %369 }
  0xa9   : > { %v414_v34 = vpop.f32.mrf.mxu0  ;;  %v1302_v35 = vpop.f32.mrf.mxu1 }
  0xaa   : > { %v415_v14 = vadd.f32 %v414_v34, %v365_v62 }
  0xad   : > { %v516_v38 = vpop.f32.mrf.mxu2 }
  0xae   : > { %v535_v39 = vpop.f32.mrf.mxu3 }
  0xb1   : > { %v416_v36 = vpop.f32.mrf.mxu0  ;;  %v1304_v37 = vpop.f32.mrf.mxu1 }
  0xb2   : > { %v417_v16 = vadd.f32 %v416_v36, %v370_v10 }
  0xb5   : > { %v518_v42 = vpop.f32.mrf.mxu2 }
  0xb6   : > { %v537_v43 = vpop.f32.mrf.mxu3 }
  0xb9   : > { %v497_v40 = vpop.f32.mrf.mxu1  ;;  %v554_v41 = vpop.f32.mrf.mxu0 }
  0xba   : > { %v640_v52 = vmax.f32 %v497_v40, %v516_v38 }
  0xbc   : > { %v644_v55 = vmax.f32 %v640_v52, %v535_v39 }
  0xbd   : > { %v521_v46 = vpop.f32.mrf.mxu2 }
  0xbe   : > { %v540_v47 = vpop.f32.mrf.mxu3  ;;  %v648_v58 = vmax.f32 %v644_v55, %v554_v41 }
  0xc1   : > { %v499_v44 = vpop.f32.mrf.mxu1  ;;  %v556_v45 = vpop.f32.mrf.mxu0 }
  0xc2   : > { %v641_v59 = vmax.f32 %v499_v44, %v518_v42  ;;  %v380_v42 = vpop.permute.xlu1 %379  ;;  %v420_v44 = vadd.f32 %v1302_v35, %v375_v25 }
  0xc4   : > { %v645_v0 = vmax.f32 %v641_v59, %v537_v43 }
  0xc5   : > { %v523_v50 = vpop.f32.mrf.mxu2 }
  0xc6   : > { %v542_v51 = vpop.f32.mrf.mxu3  ;;  %v649_v3 = vmax.f32 %v645_v0, %v556_v45 }
  0xc9   : > { %v502_v48 = vpop.f32.mrf.mxu1  ;;  %v559_v49 = vpop.f32.mrf.mxu0 }
  0xca   : > { %v642_v4 = vmax.f32 %v502_v48, %v521_v46 }
  0xcc   : > { %v646_v11 = vmax.f32 %v642_v4, %v540_v47  ;;  %v422_v47 = vadd.f32 %v1304_v37, %v380_v42 }
  0xcd   : > { %v592_v56 = vpop.f32.mrf.mxu2 }
  0xce   : > { %v611_v57 = vpop.f32.mrf.mxu3  ;;  %v650_v17 = vmax.f32 %v646_v11, %v559_v49 }
  0xd1   : > { %v504_v53 = vpop.f32.mrf.mxu1  ;;  %v561_v54 = vpop.f32.mrf.mxu0 }
  0xd2   : > { %v643_v18 = vmax.f32 %v504_v53, %v523_v50 }
  0xd4   : > { %v647_v27 = vmax.f32 %v643_v18, %v542_v51 }
  0xd5   : > { %v594_v2 = vpop.f32.mrf.mxu2 }
  0xd6   : > { %v613_v6 = vpop.f32.mrf.mxu3  ;;  %v651_v33 = vmax.f32 %v647_v27, %v561_v54 }
  0xd9   : > { %v573_v60 = vpop.f32.mrf.mxu1  ;;  %v630_v61 = vpop.f32.mrf.mxu0 }
  0xda   : > { %v652_v63 = vmax.f32 %v648_v58, %v573_v60 }
  0xdc   : > { %v656_v1 = vmax.f32 %v652_v63, %v592_v56 }
  0xdd   : > { %v597_v21 = vpop.f32.mrf.mxu2 }
  0xde   : > { %v660_v5 = vmax.f32 %v656_v1, %v611_v57  ;;  %v616_v26 = vpop.f32.mrf.mxu3 }
  0xe0   : > { %v664_v12 = vmax.f32 %v660_v5, %v630_v61 }
  0xe1   : > { %v575_v7 = vpop.f32.mrf.mxu1  ;;  %v632_v9 = vpop.f32.mrf.mxu0 }
  0xe2   : > { %v653_v8 = vmax.f32 %v649_v3, %v575_v7  ;;  %v668_v19 = vadd.f32 %v664_v12, %v415_v14 }
  0xe4   : > { %v657_v13 = vmax.f32 %v653_v8, %v594_v2  ;;  %v672_v28 = vmax.f32 %v668_v19, 0.0 }
  0xe5   : > { %v599_v39 = vpop.f32.mrf.mxu2 }
  0xe6   : > { %v661_v15 = vmax.f32 %v657_v13, %v613_v6  ;;  %v618_v43 = vpop.f32.mrf.mxu3 }
  0xe8   : > { %v665_v20 = vmax.f32 %v661_v15, %v632_v9 }
  0xe9   : > { %v578_v22 = vpop.f32.mrf.mxu1  ;;  %v635_v31 = vpop.f32.mrf.mxu0 }
  0xea   : > { %v669_v23 = vadd.f32 %v665_v20, %v417_v16  ;;  %v654_v24 = vmax.f32 %v650_v17, %v578_v22 }
  0xec   : > { %v673_v29 = vmax.f32 %v669_v23, 0.0  ;;  %v658_v30 = vmax.f32 %v654_v24, %v597_v21 }
  0xee   : > { %v923_v32 = vpack.c.bf16 %v673_v29, %v672_v28  ;;  %v662_v34 = vmax.f32 %v658_v30, %v616_v26 }
  0xf0   : > { %924 = vst [vmem:[%s331_s26] sm:$0xff] %v923_v32   ;;  %v666_v40 = vmax.f32 %v662_v34, %v635_v31 }
  0xf1   : > { %v580_v36 = vpop.f32.mrf.mxu1  ;;  %v637_v46 = vpop.f32.mrf.mxu0 }
  0xf2   : > { %v655_v38 = vmax.f32 %v651_v33, %v580_v36  ;;  %v670_v48 = vadd.f32 %v666_v40, %v420_v44 }
  0xf4   : > { %v659_v41 = vmax.f32 %v655_v38, %v599_v39  ;;  %v674_v51 = vmax.f32 %v670_v48, 0.0 }
  0xf6   : > { %v663_v45 = vmax.f32 %v659_v41, %v618_v43 }
  0xf8   : > { %v667_v49 = vmax.f32 %v663_v45, %v637_v46 }
  0xfa   : > { %v671_v50 = vadd.f32 %v667_v49, %v422_v47 }
  0xfc   : > { %v675_v52 = vmax.f32 %v671_v50, 0.0 }
  0xfe   : > { %v928_v35 = vpack.c.bf16 %v675_v52, %v674_v51 }
 0x100   : > { %930 = vst [vmem:[%s331_s26 + $0x8] sm:$0xff] %v928_v35  }
 0x101   : > { %1058 = shalt.err (!%p1055_p0)
}
 0x102   : > { %s1118_s7 = smov 64   ;;  %s1119_s26 = smov 4  }
 0x103   : > { %934 = dma.vmem_to_hbm [thread:$0]  (%p1206_p9), %s699_s30, 256, %s701_s12, %s685_s23, %s1118_s7, %s1118_s7, %s1119_s26  }
 0x104 PF: > { %s715_s27 = sand.u32 1, %s1093_s21   ;;  %p941_p1 = pnand %p820_p12, %p1213_p11 }
 0x105   : > { %s716_s29 = scalar_lea.sflag [#allocation4], %s715_s27 }
 0x106   : > { %p942_p2 = pneg %p941_p1 }
 0x108   : > { %1088 = dma.done.wait (%p942_p2), %s716_s29, 256  }
 0x109   : > { %1090 = vsyncadd (%p942_p2), %s716_s29, 4294967040  ;;  %s22_s25 = sadd.s32 1, %s1113_s25   ;;  %s1358_s21 = smov %s1097_s22 }
 0x10a   : > { %p19_p3 = scmp.ge.s32.totalorder %s22_s25, 4   ;;  %s1359_s22 = smov %s1101_s2 }
 0x10b   : > { %s1360_s2 = smov %s1211_s10  ;;  %s1361_s23 = smov %s1109_s24 }
 0x10c   : > { %s1362_s24 = smov %s1364_s28  ;;  %21 = sbr.rel (!%p19_p3) target bundleno = 6 (0x6), region = 95 }
 0x111   :  { %722 = vsyncpa [#allocation3], 1 }
 0x112   :  { %724 = vsyncpa [#allocation3 + $0x1], 1 }
 0x113   :  { %725 = vsyncpa [#allocation4], 1 }
 0x114   :  { %727 = vsyncpa [#allocation4 + $0x1], 1 }

</bundles_post_ra>
